<compile_context>
chip_gen: v7x
topology: tpu7x:2x2x1
jax: 0.10.0
libtpu: 0.0.40
codegen_flags: <defaults>
</compile_context>

<pallas_src>
import functools

import jax
import jax.numpy as jnp
from jax.experimental import pallas as pl
from jax.experimental.pallas import tpu as pltpu

_LANE = 128
_SUBLANE = 8


def _round_up(n, m):
    return ((n + m - 1) // m) * m


def _vmem_capacity_bytes():
    """Physical VMEM per TensorCore; conservative fallback if query fails."""
    try:
        info = pltpu.get_tpu_info()
        for attr in ("vmem_capacity_bytes", "vmem_size_bytes", "vmem_bytes"):
            v = getattr(info, attr, None)
            if v:
                return int(v)
    except Exception:
        pass
    return 64 * 1024 * 1024  # v7x per-TC capacity = smallest across v5e/v6e/v7x


def _default_activation_dtype():
    """bf16 tanh on chips with a bf16 VPU/EUP (v6e/v7x); f32 otherwise."""
    try:
        kind = jax.devices()[0].device_kind.lower()
    except Exception:
        return jnp.float32
    for old in ("v2", "v3", "v4", "v5"):
        if old in kind:
            return jnp.float32
    return jnp.bfloat16


# --------------------------------------------------------------------------
# Kernel: one batch tile per grid step; all three layers fused.
# --------------------------------------------------------------------------
def _valuenet_kernel(x_ref, w1_ref, b1_ref, w2_ref, b2_ref, w3_ref, b3_ref,
                     o_ref, *, out_dim, act_dtype):
    cdt = w1_ref.dtype                       # MXU operand dtype (bf16 default)
    x = x_ref[...].astype(cdt)               # no-op if caller provides bf16
    # Layer 1: Linear (f32 accumulate) + Tanh (act_dtype: bf16 on v6e/v7x).
    z1 = jnp.dot(x, w1_ref[...], preferred_element_type=jnp.float32) + b1_ref[...]
    h1 = jnp.tanh(z1.astype(act_dtype))
    # Layer 2: Linear + Tanh.
    z2 = jnp.dot(h1.astype(cdt), w2_ref[...],
                 preferred_element_type=jnp.float32) + b2_ref[...]
    h2 = jnp.tanh(z2.astype(act_dtype))
    # Layer 3: Linear only; drop the lane padding before the narrow store so
    # only the true out_dim columns ever reach HBM.
    z3 = jnp.dot(h2.astype(cdt), w3_ref[...],
                 preferred_element_type=jnp.float32) + b3_ref[...]
    o_ref[...] = z3[:, :out_dim].astype(o_ref.dtype)


# --------------------------------------------------------------------------
# Param prep: pad hidden/output dims to 128 lanes for the MXU; zero padding is
# exact (padded rows/cols/biases are 0, tanh(0)=0). Raw params are the
# (in, out)-transposed versions of PyTorch's (out, in) weights.
# --------------------------------------------------------------------------
def prepare_params(raw, weight_dtype=jnp.bfloat16):
    in_dim, hidden = raw["w1"].shape
    out_dim = raw["w3"].shape[1]
    hid_p = _round_up(hidden, _LANE)
    out_p = _round_up(out_dim, _LANE)

    def pad2(a, rows, cols):
        return jnp.pad(a, ((0, rows - a.shape[0]), (0, cols - a.shape[1])))

    return {
        "w1": pad2(raw["w1"], in_dim, hid_p).astype(weight_dtype),
        "b1": pad2(raw["b1"], 1, hid_p).astype(jnp.float32),
        "w2": pad2(raw["w2"], hid_p, hid_p).astype(weight_dtype),
        "b2": pad2(raw["b2"], 1, hid_p).astype(jnp.float32),
        "w3": pad2(raw["w3"], hid_p, out_p).astype(weight_dtype),
        "b3": pad2(raw["b3"], 1, out_p).astype(jnp.float32),
        "out_dim": out_dim,
    }


# --------------------------------------------------------------------------
# Tile choice + VMEM budgeting.
# --------------------------------------------------------------------------
def _choose_tile(batch, tile_b, min_steps=2, min_tile=512):
    b_sub = _round_up(batch, _SUBLANE)
    tile = min(_round_up(tile_b, _SUBLANE), b_sub)
    # Guarantee >= min_steps grid steps (v7x 2-TC sharding + pipelining) as
    # long as each step still carries at least `min_tile` rows.
    split = _round_up(pl.cdiv(b_sub, min_steps), _SUBLANE)
    tile = min(tile, max(split, min(min_tile, b_sub)))
    return max(tile, _SUBLANE)


def _vmem_estimate(tile, in_dim, hid_p, out_p, out_dim, wbytes, xbytes):
    weight_bytes = ((in_dim * hid_p + hid_p * hid_p + hid_p * out_p) * wbytes
                    + (2 * hid_p + out_p) * 4)
    streamed = 2 * tile * (in_dim * xbytes + out_dim * 4)   # 2x-buffered x/out
    # h1/h2 (f32 accum + bf16 copies) and the padded layer-3 accumulator.
    intermediates = tile * (12 * hid_p + 4 * out_p)
    # Weights counted twice (pipeline may double-buffer them; single-buffering
    # via pipeline_mode is a negligible ~tens-of-KiB win here) + scratch slack.
    return 2 * weight_bytes + streamed + intermediates + (4 << 20)


# --------------------------------------------------------------------------
# Wrapper: batch-tiled pallas_call with VMEM-resident weights.
# --------------------------------------------------------------------------
def value_net_forward(x, kparams, *, tile_b=4096, act_dtype=None):
    w1, b1 = kparams["w1"], kparams["b1"]
    w2, b2 = kparams["w2"], kparams["b2"]
    w3, b3 = kparams["w3"], kparams["b3"]
    out_dim = int(kparams["out_dim"])

    B, in_dim = x.shape
    hid_p = w1.shape[1]
    out_p = w3.shape[1]
    if act_dtype is None:
        act_dtype = _default_activation_dtype()

    wbytes = jnp.dtype(w1.dtype).itemsize
    xbytes = jnp.dtype(x.dtype).itemsize

    # Big tiles (amortize ~0.35 us/grid-step), >= 2 steps when the batch
    # allows, auto-shrunk to this generation's VMEM budget.
    tile = _choose_tile(B, tile_b)
    vmem_cap = _vmem_capacity_bytes()
    vmem_budget = max(vmem_cap - (12 << 20), vmem_cap // 2)
    while tile > _SUBLANE and _vmem_estimate(
            tile, in_dim, hid_p, out_p, out_dim, wbytes, xbytes) > vmem_budget:
        tile = max(_SUBLANE, _round_up(tile // 2, _SUBLANE))
    vmem_est = _vmem_estimate(tile, in_dim, hid_p, out_p, out_dim,
                              wbytes, xbytes)

    b_pad = _round_up(B, tile)
    if b_pad != B:
        x = jnp.pad(x, ((0, b_pad - B), (0, 0)))
    grid = (b_pad // tile,)

    weight_bytes = ((in_dim * hid_p + hid_p * hid_p + hid_p * out_p) * wbytes
                    + (2 * hid_p + out_p) * 4)
    cost = pl.CostEstimate(
        flops=2 * b_pad * (in_dim * hid_p + hid_p * hid_p + hid_p * out_p),
        transcendentals=2 * b_pad * hid_p,
        bytes_accessed=(b_pad * in_dim * xbytes + weight_bytes
                        + b_pad * out_dim * 4),
    )

    def const_spec(shape):
        # Same block every grid step -> weights/biases stay VMEM-resident.
        return pl.BlockSpec(shape, lambda i: (0, 0))

    kernel = functools.partial(_valuenet_kernel, out_dim=out_dim,
                               act_dtype=act_dtype)

    out = pl.pallas_call(
        kernel,
        out_shape=jax.ShapeDtypeStruct((b_pad, out_dim), jnp.float32),
        grid=grid,
        in_specs=[
            pl.BlockSpec((tile, in_dim), lambda i: (i, 0)),   # x batch tile
            const_spec(w1.shape), const_spec(b1.shape),
            const_spec(w2.shape), const_spec(b2.shape),
            const_spec(w3.shape), const_spec(b3.shape),
        ],
        # Narrow (true out_dim) output block: ~32x less writeback than the old
        # 128-lane-padded slab, and no second HBM pass to un-pad it.
        out_specs=pl.BlockSpec((tile, out_dim), lambda i: (i, 0)),
        compiler_params=pltpu.CompilerParams(
            dimension_semantics=("parallel",),
            # Always explicit (v5e scoped default is 16 MiB); capped under the
            # physical per-TC capacity (64 MiB on v7x) with headroom.
            vmem_limit_bytes=int(min(vmem_budget,
                                     max(2 * vmem_est, 32 << 20))),
        ),
        cost_estimate=cost,
    )(x, w1, b1, w2, b2, w3, b3)

    return out if b_pad == B else out[:B]


# --------------------------------------------------------------------------
# Init + reference (mirrors PyTorch nn.Linear; weights stored transposed).
# --------------------------------------------------------------------------
def init_valuenet_params(key, input_dim, hidden, output_dim):
    ks = jax.random.split(key, 6)

    def uniform(k, shape, fan_in):
        bound = 1.0 / jnp.sqrt(fan_in)
        return jax.random.uniform(k, shape, jnp.float32, -bound, bound)

    return {
        "w1": uniform(ks[0], (input_dim, hidden), input_dim),
        "b1": uniform(ks[1], (1, hidden), input_dim),
        "w2": uniform(ks[2], (hidden, hidden), hidden),
        "b2": uniform(ks[3], (1, hidden), hidden),
        "w3": uniform(ks[4], (hidden, output_dim), hidden),
        "b3": uniform(ks[5], (1, output_dim), hidden),
    }


def value_net_reference(x, raw, compute_dtype=jnp.bfloat16,
                        act_dtype=jnp.float32):
    """Pure-JAX reference using the same mixed-precision scheme as the kernel
    (bf16 MXU operands, f32 accumulation, tanh in act_dtype)."""
    cd = compute_dtype
    z1 = jnp.dot(x.astype(cd), raw["w1"].astype(cd),
                 preferred_element_type=jnp.float32) + raw["b1"]
    h1 = jnp.tanh(z1.astype(act_dtype))
    z2 = jnp.dot(h1.astype(cd), raw["w2"].astype(cd),
                 preferred_element_type=jnp.float32) + raw["b2"]
    h2 = jnp.tanh(z2.astype(act_dtype))
    return jnp.dot(h2.astype(cd), raw["w3"].astype(cd),
                   preferred_element_type=jnp.float32) + raw["b3"]


if __name__ == "__main__":
    B, INPUT_DIM, HIDDEN, OUTPUT_DIM = 8, 16, 32, 4

    key = jax.random.PRNGKey(0)
    k_x, k_x2, k_x3, k_p = jax.random.split(key, 4)
    raw_params = init_valuenet_params(k_p, INPUT_DIM, HIDDEN, OUTPUT_DIM)
    kparams = prepare_params(raw_params, weight_dtype=jnp.bfloat16)

    # Test 1: small batch, single grid step, f32 tanh (tight tolerance).
    x = jax.random.normal(k_x, (B, INPUT_DIM), dtype=jnp.float32)
    out = jax.block_until_ready(
        value_net_forward(x, kparams, act_dtype=jnp.float32))
    ref = value_net_reference(x, raw_params, act_dtype=jnp.float32)
    assert out.shape == (B, OUTPUT_DIM)
    assert jnp.allclose(out, ref, atol=1e-4, rtol=1e-4)

    # Test 2: batch not a multiple of the tile -> multi-step grid, weight
    # residency across steps, batch padding + narrow output slicing.
    B2 = 20
    x2 = jax.random.normal(k_x2, (B2, INPUT_DIM), dtype=jnp.float32)
    out2 = jax.block_until_ready(
        value_net_forward(x2, kparams, tile_b=8, act_dtype=jnp.float32))
    ref2 = value_net_reference(x2, raw_params, act_dtype=jnp.float32)
    assert out2.shape == (B2, OUTPUT_DIM)
    assert jnp.allclose(out2, ref2, atol=1e-4, rtol=1e-4)

    # Test 3: default generation-aware activation dtype (bf16 tanh on v6e/v7x,
    # f32 on v5e and older) with the default large-tile path.
    B3 = 64
    x3 = jax.random.normal(k_x3, (B3, INPUT_DIM), dtype=jnp.float32)
    act = _default_activation_dtype()
    out3 = jax.block_until_ready(value_net_forward(x3, kparams))
    ref3 = value_net_reference(x3, raw_params, act_dtype=act)
    tol = 1e-4 if act == jnp.float32 else 5e-2
    assert out3.shape == (B3, OUTPUT_DIM)
    assert jnp.allclose(out3, ref3, atol=tol, rtol=tol)

    print("KERNEL_OK")
</pallas_src>

<mosaic_0001>
module attributes {stable_mosaic.version = 11 : i64} {
  func.func @_valuenet_kernel(%arg0: i32, %arg1: memref<8x16xf32, #tpu.memory_space<vmem>>, %arg2: memref<16x128xbf16, #tpu.memory_space<vmem>>, %arg3: memref<1x128xf32, #tpu.memory_space<vmem>>, %arg4: memref<128x128xbf16, #tpu.memory_space<vmem>>, %arg5: memref<1x128xf32, #tpu.memory_space<vmem>>, %arg6: memref<128x128xbf16, #tpu.memory_space<vmem>>, %arg7: memref<1x128xf32, #tpu.memory_space<vmem>>, %arg8: memref<8x4xf32, #tpu.memory_space<vmem>>) attributes {dimension_semantics = [#tpu.dimension_semantics<parallel>], iteration_bounds = array<i64: 1>, scalar_prefetch = 0 : i64, scratch_operands = 0 : i64, tpu.core_type = #tpu.core_type<tc>, window_params = [{transform_indices = @transform_0, window_bounds = array<i64: 8, 16>}, {pipeline_mode = #tpu.pipeline_mode<synchronous>, transform_indices = @transform_1, window_bounds = array<i64: 16, 128>}, {pipeline_mode = #tpu.pipeline_mode<synchronous>, transform_indices = @transform_2, window_bounds = array<i64: 1, 128>}, {pipeline_mode = #tpu.pipeline_mode<synchronous>, transform_indices = @transform_3, window_bounds = array<i64: 128, 128>}, {pipeline_mode = #tpu.pipeline_mode<synchronous>, transform_indices = @transform_4, window_bounds = array<i64: 1, 128>}, {pipeline_mode = #tpu.pipeline_mode<synchronous>, transform_indices = @transform_5, window_bounds = array<i64: 128, 128>}, {pipeline_mode = #tpu.pipeline_mode<synchronous>, transform_indices = @transform_6, window_bounds = array<i64: 1, 128>}, {transform_indices = @transform_7, window_bounds = array<i64: 8, 4>}]} {
    %c0 = arith.constant 0 : index
    %c0_0 = arith.constant 0 : index
    %0 = vector.load %arg1[%c0, %c0_0] : memref<8x16xf32, #tpu.memory_space<vmem>>, vector<8x16xf32>
    %1 = arith.truncf %0 : vector<8x16xf32> to vector<8x16xbf16>
    %c0_1 = arith.constant 0 : index
    %c0_2 = arith.constant 0 : index
    %2 = vector.load %arg2[%c0_1, %c0_2] : memref<16x128xbf16, #tpu.memory_space<vmem>>, vector<16x128xbf16>
    %cst = arith.constant dense<0.000000e+00> : vector<8x128xf32>
    %3 = tpu.matmul %1, %2, %cst {dimension_numbers = #tpu.dot_dimension_numbers<[1], [0], [0], [1], [0, 0, 1, 1], [], []>} : vector<8x16xbf16>, vector<16x128xbf16>, vector<8x128xf32> -> vector<8x128xf32>
    %c0_3 = arith.constant 0 : index
    %c0_4 = arith.constant 0 : index
    %4 = vector.load %arg3[%c0_3, %c0_4] : memref<1x128xf32, #tpu.memory_space<vmem>>, vector<1x128xf32>
    %5 = vector.broadcast %4 : vector<1x128xf32> to vector<8x128xf32>
    %6 = arith.addf %3, %5 : vector<8x128xf32>
    %7 = math.tanh %6 : vector<8x128xf32>
    %8 = arith.truncf %7 : vector<8x128xf32> to vector<8x128xbf16>
    %c0_5 = arith.constant 0 : index
    %c0_6 = arith.constant 0 : index
    %9 = vector.load %arg4[%c0_5, %c0_6] : memref<128x128xbf16, #tpu.memory_space<vmem>>, vector<128x128xbf16>
    %cst_7 = arith.constant dense<0.000000e+00> : vector<8x128xf32>
    %10 = tpu.matmul %8, %9, %cst_7 {dimension_numbers = #tpu.dot_dimension_numbers<[1], [0], [0], [1], [0, 0, 1, 1], [], []>} : vector<8x128xbf16>, vector<128x128xbf16>, vector<8x128xf32> -> vector<8x128xf32>
    %c0_8 = arith.constant 0 : index
    %c0_9 = arith.constant 0 : index
    %11 = vector.load %arg5[%c0_8, %c0_9] : memref<1x128xf32, #tpu.memory_space<vmem>>, vector<1x128xf32>
    %12 = vector.broadcast %11 : vector<1x128xf32> to vector<8x128xf32>
    %13 = arith.addf %10, %12 : vector<8x128xf32>
    %14 = math.tanh %13 : vector<8x128xf32>
    %15 = arith.truncf %14 : vector<8x128xf32> to vector<8x128xbf16>
    %c0_10 = arith.constant 0 : index
    %c0_11 = arith.constant 0 : index
    %16 = vector.load %arg6[%c0_10, %c0_11] : memref<128x128xbf16, #tpu.memory_space<vmem>>, vector<128x128xbf16>
    %cst_12 = arith.constant dense<0.000000e+00> : vector<8x128xf32>
    %17 = tpu.matmul %15, %16, %cst_12 {dimension_numbers = #tpu.dot_dimension_numbers<[1], [0], [0], [1], [0, 0, 1, 1], [], []>} : vector<8x128xbf16>, vector<128x128xbf16>, vector<8x128xf32> -> vector<8x128xf32>
    %c0_13 = arith.constant 0 : index
    %c0_14 = arith.constant 0 : index
    %18 = vector.load %arg7[%c0_13, %c0_14] : memref<1x128xf32, #tpu.memory_space<vmem>>, vector<1x128xf32>
    %19 = vector.broadcast %18 : vector<1x128xf32> to vector<8x128xf32>
    %20 = arith.addf %17, %19 : vector<8x128xf32>
    %21 = vector.extract_strided_slice %20 {offsets = [0, 0], sizes = [8, 4], strides = [1, 1]} : vector<8x128xf32> to vector<8x4xf32>
    %c0_15 = arith.constant 0 : index
    %c0_16 = arith.constant 0 : index
    %22 = vector.load %arg8[%c0_15, %c0_16] : memref<8x4xf32, #tpu.memory_space<vmem>>, vector<8x4xf32>
    tpu.vector_store %arg8[%c0_15, %c0_16], %21 {strides = array<i32>} : memref<8x4xf32, #tpu.memory_space<vmem>>, vector<8x4xf32>,
    return
  }
  func.func @transform_0(%arg0: i32) -> (i32, i32) {
    %c0_i32 = arith.constant 0 : i32
    %c0_i32_0 = arith.constant 0 : i32
    return %arg0, %c0_i32 : i32, i32
  }
  func.func @transform_1(%arg0: i32) -> (i32, i32) {
    %c0_i32 = arith.constant 0 : i32
    %c0_i32_0 = arith.constant 0 : i32
    %c0_i32_1 = arith.constant 0 : i32
    return %c0_i32, %c0_i32_0 : i32, i32
  }
  func.func @transform_2(%arg0: i32) -> (i32, i32) {
    %c0_i32 = arith.constant 0 : i32
    %c0_i32_0 = arith.constant 0 : i32
    %c0_i32_1 = arith.constant 0 : i32
    return %c0_i32, %c0_i32_0 : i32, i32
  }
  func.func @transform_3(%arg0: i32) -> (i32, i32) {
    %c0_i32 = arith.constant 0 : i32
    %c0_i32_0 = arith.constant 0 : i32
    %c0_i32_1 = arith.constant 0 : i32
    return %c0_i32, %c0_i32_0 : i32, i32
  }
  func.func @transform_4(%arg0: i32) -> (i32, i32) {
    %c0_i32 = arith.constant 0 : i32
    %c0_i32_0 = arith.constant 0 : i32
    %c0_i32_1 = arith.constant 0 : i32
    return %c0_i32, %c0_i32_0 : i32, i32
  }
  func.func @transform_5(%arg0: i32) -> (i32, i32) {
    %c0_i32 = arith.constant 0 : i32
    %c0_i32_0 = arith.constant 0 : i32
    %c0_i32_1 = arith.constant 0 : i32
    return %c0_i32, %c0_i32_0 : i32, i32
  }
  func.func @transform_6(%arg0: i32) -> (i32, i32) {
    %c0_i32 = arith.constant 0 : i32
    %c0_i32_0 = arith.constant 0 : i32
    %c0_i32_1 = arith.constant 0 : i32
    return %c0_i32, %c0_i32_0 : i32, i32
  }
  func.func @transform_7(%arg0: i32) -> (i32, i32) {
    %c0_i32 = arith.constant 0 : i32
    %c0_i32_0 = arith.constant 0 : i32
    return %arg0, %c0_i32 : i32, i32
  }
}

</mosaic_0001>

<bundles_post_ra>
// kernel: tpu_custom_call.1
= control target key start
LH: loop header
LB: loop body
LE: loop exit
PB: predicated region body
PF: predicated region fallthrough
CT: control target
= control target key end

     0   :  { %12 = vsyncpa [#allocation3], 0  ;;  %s726_s0 = inlined_call_operand.hbm [shape: f32[8,16], index: 0, kind: input, shape index: {}]   ;;  %s727_s1 = inlined_call_operand.hbm [shape: bf16[16,128], index: 1, kind: input, shape index: {}]   ;;  %s728_s2 = inlined_call_operand.vmem [shape: f32[1,128], index: 2, kind: input, shape index: {}]   ;;  %s729_s3 = inlined_call_operand.hbm [shape: bf16[128,128], index: 3, kind: input, shape index: {}]   ;;  %s730_s4 = inlined_call_operand.vmem [shape: f32[1,128], index: 4, kind: input, shape index: {}]   ;;  %s731_s5 = inlined_call_operand.hbm [shape: bf16[128,128], index: 5, kind: input, shape index: {}]   ;;  %s732_s6 = inlined_call_operand.vmem [shape: f32[1,128], index: 6, kind: input, shape index: {}]   ;;  %s733_s7 = inlined_call_operand.vmem [shape: f32[8,4], index: 7, kind: output, shape index: {}]  }
   0x1   :  { %13 = vsyncpa [#allocation5], 0 }
   0x2   :  { %14 = vsyncpa [#allocation8], 0  ;;  %s586_s24 = smov [#allocation4]   ;;  %s492_s28 = scalar_lea.hbm %s727_s1, 128 }
   0x3   :  { %s30_s25 = sshll.u32 %s586_s24, 4  ;;  %p493_p0 = scmp.ne.s32.totalorder %s727_s1, %s492_s28  ;;  %s31_s25 = int_to_ptr.vmem [resolvable:$true] %s30_s25 }
   0x4   :  { %p496_p1 = scmp.lt.u32.totalorder %s492_s28, %s727_s1 }
   0x6   :  { %p498_p2 = pnand %p496_p1, %p493_p0 }
   0x8   :  { %501 = shalt.err (!%p498_p2)
}
   0x9   :  { %s502_s10 = scalar_lea.vmem %s31_s25, 128  ;;  %p507_p4 = scmp.lt.s32.totalorder %s31_s25, %s31_s25 }
   0xa   :  { %p503_p3 = scmp.ne.s32.totalorder %s31_s25, %s502_s10  ;;  %p508_p5 = scmp.lt.s32.totalorder %s502_s10, %s502_s10 }
   0xc   :  { %p509_p6 = por %p508_p5, %p507_p4 }
   0xe   :  { %p510_p7 = pnand %p509_p6, %p503_p3 }
  0x10   :  { %513 = shalt.err (!%p510_p7)
}
  0x11   :  { %s587_s11 = smov 64   ;;  %s588_s12 = smov 4  }
  0x12   :  { %36 = dma.hbm_to_vmem [thread:$0]  %s727_s1, 128, %s31_s25, [#allocation5], %s587_s11, %s587_s11, %s588_s12  }
  0x13   :  { %s589_s15 = smov [#allocation2]   ;;  %s590_s17 = smov [#allocation6]  }
  0x14   :  { %s21_s16 = sshll.u32 %s589_s15, 4  ;;  %s44_s18 = sshll.u32 %s590_s17, 4  ;;  %s22_s16 = int_to_ptr.vmem [resolvable:$true] %s21_s16  ;;  %s45_s18 = int_to_ptr.vmem [resolvable:$true] %s44_s18 }
  0x15   :  { %s514_s21 = scalar_lea.hbm %s726_s0, 128 }
  0x16   :  { %p515_p8 = scmp.ne.s32.totalorder %s726_s0, %s514_s21  ;;  %p518_p9 = scmp.lt.u32.totalorder %s514_s21, %s726_s0 }
  0x18   :  { %p520_p10 = pnand %p518_p9, %p515_p8 }
  0x1a   :  { %523 = shalt.err (!%p520_p10)
}
  0x1b   :  { %s524_s1 = scalar_lea.vmem %s22_s16, 128  ;;  %p529_p12 = scmp.lt.s32.totalorder %s22_s16, %s22_s16 }
  0x1c   :  { %p525_p11 = scmp.ne.s32.totalorder %s22_s16, %s524_s1  ;;  %p530_p13 = scmp.lt.s32.totalorder %s524_s1, %s524_s1 }
  0x1e   :  { %p531_p0 = por %p530_p13, %p529_p12 }
  0x20   :  { %p532_p1 = pnand %p531_p0, %p525_p11 }
  0x22   :  { %535 = shalt.err (!%p532_p1)
}
  0x23   :  { %24 = dma.hbm_to_vmem [thread:$0]  %s726_s0, 128, %s22_s16, [#allocation3]  }
  0x24   :  { %s536_s30 = scalar_lea.hbm %s729_s3, 1024 }
  0x25   :  { %p537_p2 = scmp.ne.s32.totalorder %s729_s3, %s536_s30  ;;  %p540_p3 = scmp.lt.u32.totalorder %s536_s30, %s729_s3 }
  0x27   :  { %p542_p4 = pnand %p540_p3, %p537_p2 }
  0x29   :  { %545 = shalt.err (!%p542_p4)
}
  0x2a   :  { %s546_s14 = scalar_lea.vmem %s45_s18, 1024  ;;  %p551_p6 = scmp.lt.s32.totalorder %s45_s18, %s45_s18 }
  0x2b   :  { %p547_p5 = scmp.ne.s32.totalorder %s45_s18, %s546_s14  ;;  %p552_p7 = scmp.lt.s32.totalorder %s546_s14, %s546_s14 }
  0x2d   :  { %p553_p8 = por %p552_p7, %p551_p6 }
  0x2f   :  { %p554_p9 = pnand %p553_p8, %p547_p5 }
  0x31   :  { %557 = shalt.err (!%p554_p9)
}
  0x32   :  { %50 = dma.hbm_to_vmem [thread:$0]  %s729_s3, 1024, %s45_s18, [#allocation5], %s587_s11, %s587_s11, %s588_s12  }
  0x33   :  { %s591_s16 = smov [#allocation7]   ;;  %s558_s21 = scalar_lea.hbm %s731_s5, 1024 }
  0x34   :  { %s58_s17 = sshll.u32 %s591_s16, 4  ;;  %p559_p10 = scmp.ne.s32.totalorder %s731_s5, %s558_s21  ;;  %s59_s17 = int_to_ptr.vmem [resolvable:$true] %s58_s17 }
  0x35   :  { %p562_p11 = scmp.lt.u32.totalorder %s558_s21, %s731_s5 }
  0x37   :  { %p564_p12 = pnand %p562_p11, %p559_p10 }
  0x39   :  { %567 = shalt.err (!%p564_p12)
}
  0x3a   :  { %s568_s1 = scalar_lea.vmem %s59_s17, 1024  ;;  %p573_p0 = scmp.lt.s32.totalorder %s59_s17, %s59_s17 }
  0x3b   :  { %p569_p13 = scmp.ne.s32.totalorder %s59_s17, %s568_s1  ;;  %p574_p1 = scmp.lt.s32.totalorder %s568_s1, %s568_s1 }
  0x3d   :  { %p575_p2 = por %p574_p1, %p573_p0 }
  0x3f   :  { %p576_p3 = pnand %p575_p2, %p569_p13 }
  0x41   :  { %579 = shalt.err (!%p576_p3)
}
  0x42   :  { %64 = dma.hbm_to_vmem [thread:$0]  %s731_s5, 1024, %s59_s17, [#allocation8], %s587_s11, %s587_s11, %s588_s12  }
  0x43   :  { %580 = dma.done.wait [#allocation3], 128  }
  0x44   :  { %581 = vsyncadd [#allocation3], 4294967168 }
  0x45   :  { %582 = dma.done.wait [#allocation5], 1152  }
  0x46   :  { %583 = vsyncadd [#allocation5], 4294966144 }
  0x47   :  { %584 = dma.done.wait [#allocation8], 1024  }
  0x48   :  { %585 = vsyncadd [#allocation8], 4294966272  ;;  %v592_v0 = vmov 0.0   ;;  %vm593_vm0 = vmmov 0   ;;  %v471_v1 = vld [vmem:[#allocation4] sm:$0xff]   ;;  %v80_v2 = vld [vmem:[#allocation2] sm:$0xff] }
  0x49   :  { %417 = vmatprep.subr.bf16.mxu0 %v592_v0  ;;  %419 = vmatprep.mubr.msk.bf16.mxu0 %vm593_vm0, %v592_v0  ;;  %v81_v3 = vpack.c.bf16 %v80_v2, %v80_v2  ;;  %vm97_vm1 = vcmask 130048   ;;  %v472_v4 = vld [vmem:[#allocation6] sm:$0xff]   ;;  %v473_v5 = vld [vmem:[#allocation6 + $0x8] sm:$0xff]   ;;  %v474_v6 = vld [vmem:[#allocation6 + $0x10] sm:$0xff]   ;;  %vm367_vm2 = vcmask 31744  }
  0x4a   :  { %423 = vmatprep.subr.bf16.mxu1 %v592_v0  ;;  %439 = vmatprep.mubr.msk.bf16.mxu1 %vm593_vm0, %v592_v0  ;;  %v475_v7 = vld [vmem:[#allocation6 + $0x18] sm:$0xff]   ;;  %v476_v8 = vld [vmem:[#allocation6 + $0x20] sm:$0xff]   ;;  %v477_v9 = vld [vmem:[#allocation6 + $0x28] sm:$0xff]  }
  0x4b   :  { %418 = vmatpush3.bf16.msra.mxu0 %v471_v1  ;;  %424 = vmatpush3.bf16.msra.mxu1 %v472_v4  ;;  %v478_v10 = vld [vmem:[#allocation6 + $0x30] sm:$0xff]   ;;  %v479_v11 = vld [vmem:[#allocation6 + $0x38] sm:$0xff]   ;;  %v480_v12 = vld [vmem:[#allocation7] sm:$0xff]  }
  0x4c   :  { %443 = vmatprep.subr.bf16.mxu0 %v592_v0  ;;  %425 = vmatprep.subr.bf16.mxu1 %v592_v0  ;;  %v481_v13 = vld [vmem:[#allocation7 + $0x8] sm:$0xff]   ;;  %v482_v14 = vld [vmem:[#allocation7 + $0x10] sm:$0xff]   ;;  %v483_v15 = vld [vmem:[#allocation7 + $0x18] sm:$0xff]  }
  0x4d   :  { %v376_v16 = vld [vmem:[%s728_s2] ss:$0 sm:$0xff]  ;;  %v484_v24 = vld [vmem:[#allocation7 + $0x20] sm:$0xff]   ;;  %v485_v25 = vld [vmem:[#allocation7 + $0x28] sm:$0xff]  }
  0x4e   :  { %420 = vmatmul.mubr.msk.bf16.vlgmr.msra.gmra.mrb[0].mxu0 %vm97_vm1, %v81_v3  ;;  %v486_v26 = vld [vmem:[#allocation7 + $0x30] sm:$0xff]   ;;  %v487_v27 = vld [vmem:[#allocation7 + $0x38] sm:$0xff]  }
  0x4f   :  { %459 = vmatprep.mubr.msk.bf16.mxu0 %vm593_vm0, %v592_v0  ;;  %426 = vmatpush3.bf16.msra.mxu1 %v473_v5  ;;  %v379_v28 = vld [vmem:[%s730_s4] ss:$0 sm:$0xff] }
  0x50   :  { %427 = vmatprep.subr.bf16.mxu1 %v592_v0  ;;  %444 = vmatpush3.bf16.msra.mxu0 %v480_v12  ;;  %v388_v36 = vld [vmem:[%s732_s6] ss:$0 sm:$0xff] }
  0x51   :  { %445 = vmatprep.subr.bf16.mxu0 %v592_v0 }
  0x53   :  { %428 = vmatpush3.bf16.msra.mxu1 %v474_v6 }
  0x54   :  { %429 = vmatprep.subr.bf16.mxu1 %v592_v0  ;;  %446 = vmatpush3.bf16.msra.mxu0 %v481_v13 }
  0x55   :  { %447 = vmatprep.subr.bf16.mxu0 %v592_v0 }
  0x57   :  { %430 = vmatpush3.bf16.msra.mxu1 %v475_v7 }
  0x58   :  { %431 = vmatprep.subr.bf16.mxu1 %v592_v0  ;;  %448 = vmatpush3.bf16.msra.mxu0 %v482_v14 }
  0x59   :  { %449 = vmatprep.subr.bf16.mxu0 %v592_v0 }
  0x5b   :  { %432 = vmatpush3.bf16.msra.mxu1 %v476_v8 }
  0x5c   :  { %433 = vmatprep.subr.bf16.mxu1 %v592_v0  ;;  %450 = vmatpush3.bf16.msra.mxu0 %v483_v15 }
  0x5d   :  { %451 = vmatprep.subr.bf16.mxu0 %v592_v0 }
  0x5f   :  { %434 = vmatpush3.bf16.msra.mxu1 %v477_v9 }
  0x60   :  { %435 = vmatprep.subr.bf16.mxu1 %v592_v0  ;;  %452 = vmatpush3.bf16.msra.mxu0 %v484_v24 }
  0x61   :  { %453 = vmatprep.subr.bf16.mxu0 %v592_v0 }
  0x63   :  { %436 = vmatpush3.bf16.msra.mxu1 %v478_v10 }
  0x64   :  { %437 = vmatprep.subr.bf16.mxu1 %v592_v0  ;;  %454 = vmatpush3.bf16.msra.mxu0 %v485_v25 }
  0x65   :  { %455 = vmatprep.subr.bf16.mxu0 %v592_v0 }
  0x67   :  { %438 = vmatpush3.bf16.msra.mxu1 %v479_v11 }
  0x68   :  { %456 = vmatpush3.bf16.msra.mxu0 %v486_v26 }
  0x69   :  { %457 = vmatprep.subr.bf16.mxu0 %v592_v0 }
  0x6c   :  { %458 = vmatpush3.bf16.msra.mxu0 %v487_v27 }
 0x121   :  { %v135_v17 = vpop.f32.mrb[0].mxu0 }
 0x122   :  { %v136_v18 = vadd.f32 %v376_v16, %v135_v17  ;;  %v421_v19 = vpop.f32.mrb[1].mxu0 }
 0x123   :  { %v138_v20 = vpop.f32.mrb[2].mxu0 }
 0x124   :  { %488 = vtanh.f32 %v136_v18  ;;  %v422_v21 = vpop.f32.mrb[3].mxu0 }
 0x12e   :  { %v489_v22 = vpop.eup %488 }
 0x12f   :  { %v142_v23 = vpack.c.bf16 %v489_v22, %v489_v22 }
 0x131   :  { %440 = vmatmul.mubr.bf16.vlgmr.msra.gmra.mrb[0].mxu1 %v142_v23 }
 0x204   :  { %v248_v29 = vpop.f32.mrb[0].mxu1 }
 0x205   :  { %v249_v30 = vadd.f32 %v379_v28, %v248_v29  ;;  %v441_v31 = vpop.f32.mrb[1].mxu1 }
 0x206   :  { %v251_v32 = vpop.f32.mrb[2].mxu1 }
 0x207   :  { %490 = vtanh.f32 %v249_v30  ;;  %v442_v33 = vpop.f32.mrb[3].mxu1 }
 0x211   :  { %v491_v34 = vpop.eup %490 }
 0x212   :  { %v255_v35 = vpack.c.bf16 %v491_v34, %v491_v34 }
 0x214   :  { %460 = vmatmul.mubr.bf16.vlgmr.msra.gmra.mrb[4].mxu0 %v255_v35 }
 0x2e7   :  { %v361_v37 = vpop.f32.mrb[4].mxu0 }
 0x2e8   :  { %v362_v38 = vadd.f32 %v388_v36, %v361_v37  ;;  %v461_v39 = vpop.f32.mrb[5].mxu0 }
 0x2e9   :  { %v364_v40 = vpop.f32.mrb[6].mxu0 }
 0x2ea   :  { %368 = vst.msk [vmem:[%s733_s7] sm:$0xff] %vm367_vm2, %v362_v38  ;;  %v462_v41 = vpop.f32.mrb[7].mxu0 }
 0x2eb   :  { %373 = vsyncpa [#allocation3], 1 }
 0x2ec   :  { %374 = vsyncpa [#allocation5], 1 }
 0x2ed   :  { %375 = vsyncpa [#allocation8], 1 }

</bundles_post_ra>
